<compile_context>
chip_gen: v5e
topology: v5e:2x2
jax: 0.10.0
libtpu: 0.0.40
codegen_flags: <defaults>
</compile_context>

<pallas_src>
import jax
import jax.numpy as jnp
from jax.experimental import pallas as pl
from jax.experimental.pallas import tpu as pltpu

_TILE_BYTES = 8 * 1024 * 1024          # ~8 MiB per buffer (per review, v6e/v7x)
_VMEM_LIMIT = 48 * 1024 * 1024         # 4 live buffers (32 MiB) + scratch headroom
_LANE_CANDIDATES = (1024, 512, 256, 128)


def img_recon_forward(x: jax.Array) -> jax.Array:
    """ImgRecon.forward equivalent.

    The reference forward is a no-op, so the fastest correct implementation is
    to return the input unchanged: no pallas_call, no HBM traffic.
    """
    return x


def _copy_kernel(x_ref, o_ref):
    # Pure pass-through: load the VMEM tile and store it unchanged.
    o_ref[...] = x_ref[...]


def _tiled_identity_2d(x2d: jax.Array, tile_rows: int) -> jax.Array:
    rows, lanes = x2d.shape
    grid = (pl.cdiv(rows, tile_rows),)
    return pl.pallas_call(
        _copy_kernel,
        out_shape=jax.ShapeDtypeStruct(x2d.shape, x2d.dtype),
        grid=grid,
        # Lane dim is full-extent and a multiple of 128; row tiles are either
        # 8-aligned or the full row count, so every block satisfies (8, 128).
        in_specs=[pl.BlockSpec((tile_rows, lanes), lambda i: (i, 0))],
        out_specs=pl.BlockSpec((tile_rows, lanes), lambda i: (i, 0)),
        compiler_params=pltpu.CompilerParams(
            # Row tiles are independent -> shard across both TensorCores on
            # v7x; neutral on single-TC v5e / v6e.
            dimension_semantics=("parallel",),
            vmem_limit_bytes=_VMEM_LIMIT,
        ),
    )(x2d)


@jax.jit
def img_recon_forward_pallas(x: jax.Array) -> jax.Array:
    """Identity realized as an explicit, pipelined Pallas streaming copy.

    Kept so a real kernel exists and is exercised; `img_recon_forward` above
    is the recommended (zero-cost) path for this no-op module.
    """
    orig_shape = x.shape
    numel = x.size

    if numel == 0:
        return x

    # Pick the widest lane-dense flattening that divides the element count.
    lanes = 0
    for cand in _LANE_CANDIDATES:
        if numel % cand == 0:
            lanes = cand
            break
    if lanes == 0:
        # TODO(synk): ragged element count (not a multiple of 128) — a kernel
        # here would emit masked lane-sparse stores; since the op is a no-op,
        # bypass the kernel and return the input directly.
        return x

    rows = numel // lanes
    dtype_bytes = jnp.dtype(x.dtype).itemsize

    # Largest 8-aligned row tile giving ~8 MiB per buffer.
    max_rows = max(8, (_TILE_BYTES // (lanes * dtype_bytes)) // 8 * 8)

    if rows > max_rows:
        tile_rows = max_rows
    elif rows >= 16:
        # Split into >= 2 tiles so the "parallel" grid axis gives both v7x
        # TensorCores work for mid-size arrays.
        half = -(-rows // 2)                       # ceil(rows / 2)
        tile_rows = min(max(8, (half + 7) // 8 * 8), max_rows)
    else:
        # Tiny array: one full-extent block (legal: equals the full dim).
        tile_rows = rows

    x2d = x.reshape(rows, lanes)                   # metadata-only reshape
    out2d = _tiled_identity_2d(x2d, tile_rows)
    return out2d.reshape(orig_shape)


if __name__ == "__main__":
    key = jax.random.PRNGKey(0)
    # Small NCHW input consistent with an image-reconstruction module.
    x = jax.random.normal(key, (2, 4, 16, 16), dtype=jnp.float32)

    # Fast (recommended) path: pure pass-through, no kernel launch.
    y_fast = img_recon_forward(x)
    assert y_fast is x

    # Pallas path: run the kernel once and verify identity semantics.
    y = img_recon_forward_pallas(x)
    jax.block_until_ready(y)

    assert y.shape == x.shape
    assert y.dtype == x.dtype
    assert jnp.allclose(y, x)

    print("KERNEL_OK")
</pallas_src>

<mosaic_0001>
module attributes {stable_mosaic.version = 11 : i64} {
  func.func @_copy_kernel(%arg0: i32, %arg1: memref<2x1024xf32, #tpu.memory_space<vmem>>, %arg2: memref<2x1024xf32, #tpu.memory_space<vmem>>) attributes {dimension_semantics = [#tpu.dimension_semantics<parallel>], iteration_bounds = array<i64: 1>, scalar_prefetch = 0 : i64, scratch_operands = 0 : i64, tpu.core_type = #tpu.core_type<tc>, window_params = [{transform_indices = @transform_0, window_bounds = array<i64: 2, 1024>}, {transform_indices = @transform_1, window_bounds = array<i64: 2, 1024>}]} {
    %c0 = arith.constant 0 : index
    %c0_0 = arith.constant 0 : index
    %0 = vector.load %arg1[%c0, %c0_0] : memref<2x1024xf32, #tpu.memory_space<vmem>>, vector<2x1024xf32>
    %c0_1 = arith.constant 0 : index
    %c0_2 = arith.constant 0 : index
    %1 = vector.load %arg2[%c0_1, %c0_2] : memref<2x1024xf32, #tpu.memory_space<vmem>>, vector<2x1024xf32>
    tpu.vector_store %arg2[%c0_1, %c0_2], %0 {strides = array<i32>} : memref<2x1024xf32, #tpu.memory_space<vmem>>, vector<2x1024xf32>,
    return
  }
  func.func @transform_0(%arg0: i32) -> (i32, i32) {
    %c0_i32 = arith.constant 0 : i32
    %c0_i32_0 = arith.constant 0 : i32
    return %arg0, %c0_i32 : i32, i32
  }
  func.func @transform_1(%arg0: i32) -> (i32, i32) {
    %c0_i32 = arith.constant 0 : i32
    %c0_i32_0 = arith.constant 0 : i32
    return %arg0, %c0_i32 : i32, i32
  }
}

</mosaic_0001>

<bundles_post_ra>
// kernel: img_recon_forward_pallas.1
= control target key start
LH: loop header
LB: loop body
LE: loop exit
PB: predicated region body
PF: predicated region fallthrough
CT: control target
= control target key end

     0   :  { %s38_s0 = inlined_call_operand.vmem [shape: f32[2,1024], index: 0, kind: input, shape index: {}]   ;;  %s39_s1 = inlined_call_operand.vmem [shape: f32[2,1024], index: 1, kind: output, shape index: {}]  }
   0x1   :  { %v8_v0 = vld [vmem:[%s38_s0] sm:$0xff]  ;;  %v9_v1 = vld [vmem:[%s38_s0 + $0x8] sm:$0xff] }
   0x2   :  { %10 = vst [vmem:[%s39_s1] sm:$0xff] %v8_v0 }
   0x3   :  { %11 = vst [vmem:[%s39_s1 + $0x8] sm:$0xff] %v9_v1 }

</bundles_post_ra>
